<compile_context>
chip_gen: v6e
topology: v6e:2x2x1
jax: 0.10.0
libtpu: 0.0.40
codegen_flags: <defaults>
</compile_context>

<pallas_src>
import math

import jax
import jax.numpy as jnp
import numpy as np
from jax import lax
from jax.experimental import pallas as pl
from jax.experimental.pallas import tpu as pltpu


# ------------------------------ fused kernel --------------------------------

def _make_fused_decoder_kernel(B, channels, timesteps, kernel_size):
    """channels/timesteps are already in decoder (reversed) order."""
    C = list(channels)
    T = list(timesteps)
    K = kernel_size
    num_layers = len(T) - 1
    C0, T0 = C[0], T[0]
    pad0 = (K - 1) // 2 if num_layers > 0 else 0     # layer-0 dilation = 1
    Tp0 = T0 + 2 * pad0

    def kernel(x_ref, lwT_ref, lb_ref, *args):
        o_ref = args[-1]
        layer_refs = args[:-1]

        # VectorToTensorBlock: Linear(latent -> C0*Tp0).  Layer-0 'same' padding is already
        # folded into zero columns of the weight/bias, so the reshape yields the padded slab.
        h_full = (
            jnp.dot(x_ref[...], lwT_ref[...], preferred_element_type=jnp.float32)
            + lb_ref[...]
        )  # (B, C0*Tp0)

        # Row-major reshape (B, C0*Tp0) -> (B*C0, Tp0): ONE concat of B*C0 static lane slices.
        hp = jnp.concatenate(
            [h_full[b:b + 1, c * Tp0:(c + 1) * Tp0]
             for b in range(B) for c in range(C0)],
            axis=0,
        )  # (B*C0, Tp0) -- already padded for layer 0

        for li in range(num_layers):
            wb_ref = layer_refs[3 * li]
            bb_ref = layer_refs[3 * li + 1]
            u_ref = layer_refs[3 * li + 2]
            dil = 2 ** li
            Ti = T[li]

            # im2col: K dilated taps stacked along sublanes -> one matmul for all batches
            taps = [hp[:, k * dil:k * dil + Ti] for k in range(K)]    # each (B*Cin, Ti)
            xcat = jnp.concatenate(taps, axis=0)                      # (K*B*Cin, Ti)

            y = (jnp.dot(wb_ref[...], xcat, preferred_element_type=jnp.float32)
                 + bb_ref[...])                                       # (B*Cout, Ti)
            # TODO(synk): torch nn.GELU() default is exact erf; tanh approx assumed here.
            y = jax.nn.gelu(y, approximate=True)
            # SkipConnection: residual = conv's center tap == the unpadded layer input (odd K)
            h = y + taps[K // 2]

            # nn.Upsample(nearest) as a 0/1 matmul; next layer's 'same' padding pre-folded in.
            hp = jnp.dot(h, u_ref[...], preferred_element_type=jnp.float32)

        # Single lane-dense store of the whole (B*C_last, T_last) slab.
        o_ref[...] = hp.astype(o_ref.dtype)

    return kernel


def skip_decoder_forward(prepped, x, channels, timesteps, kernel_size):
    """x: (B, latent_dim) -> (B, channels[0], timesteps[0])  [PyTorch NCL output]."""
    channels = list(channels[::-1])
    timesteps = list(timesteps[::-1])
    B = x.shape[0]
    C_last, T_last = channels[-1], timesteps[-1]

    kern = _make_fused_decoder_kernel(B, channels, timesteps, kernel_size)

    args = [x, prepped["lin_wT"], prepped["lin_b"]]
    for wb, bb, U in prepped["layers"]:
        args += [wb, bb, U]

    def full_spec(shape):
        nd = len(shape)
        return pl.BlockSpec(shape, lambda i, _n=nd: (0,) * _n)

    out2d = pl.pallas_call(
        kern,
        out_shape=jax.ShapeDtypeStruct((B * C_last, T_last), jnp.float32),
        grid=(1,),
        in_specs=[full_spec(a.shape) for a in args],
        out_specs=full_spec((B * C_last, T_last)),
        compiler_params=pltpu.CompilerParams(dimension_semantics=("arbitrary",)),
    )(*args)
    # Row-major reshape back to PyTorch NCL convention -- free in the XLA wrapper.
    return out2d.reshape(B, C_last, T_last)


# ------------------------- parameter init / prep -----------------------------

def init_params(key, latent_dim, channels, timesteps, kernel_size):
    """Raw parameters in PyTorch layout (Linear: (N, L); Conv1d: (C_out, C_in, K))."""
    channels = list(channels[::-1])
    timesteps = list(timesteps[::-1])
    num_layers = len(timesteps) - 1
    keys = jax.random.split(key, 2 + 2 * num_layers)
    params = {}
    n_out = channels[0] * timesteps[0]
    bnd = 1.0 / math.sqrt(latent_dim)
    params["lin_w"] = jax.random.uniform(keys[0], (n_out, latent_dim), jnp.float32, -bnd, bnd)
    params["lin_b"] = jax.random.uniform(keys[1], (n_out,), jnp.float32, -bnd, bnd)
    convs = []
    for i in range(num_layers):
        bnd = 1.0 / math.sqrt(channels[i] * kernel_size)
        w = jax.random.uniform(
            keys[2 + 2 * i], (channels[i + 1], channels[i], kernel_size),
            jnp.float32, -bnd, bnd)
        b = jax.random.uniform(keys[3 + 2 * i], (channels[i + 1],), jnp.float32, -bnd, bnd)
        convs.append((w, b))
    params["convs"] = convs
    return params


def prepare_params(params, channels, timesteps, kernel_size, batch_size):
    """Hoist every transpose / reshape / padding / upsample matrix out of the forward.

    Precomputes (once):
      * Linear weight/bias with layer-0 'same' padding folded in as zero columns,
      * per-layer block-diagonal-over-batch im2col conv weight (B*Cout, K*B*Cin) + tiled bias,
      * per-layer nearest-upsample 0/1 matrix with the NEXT layer's padding pre-folded.
    """
    channels = list(channels[::-1])
    timesteps = list(timesteps[::-1])
    num_layers = len(timesteps) - 1
    K = kernel_size
    B = batch_size
    if K % 2 != 1:
        raise ValueError("padding='same' dilated Conv1d here requires an odd kernel_size")

    C0, T0 = channels[0], timesteps[0]
    pad0 = (K - 1) // 2 if num_layers > 0 else 0
    Tp0 = T0 + 2 * pad0

    # Linear weight/bias with layer-0 'same' padding folded in (zero columns).
    lwT = np.asarray(params["lin_w"], np.float32).T.reshape(-1, C0, T0)   # (L, C0, T0)
    L = lwT.shape[0]
    lwT_p = np.zeros((L, C0, Tp0), np.float32)
    lwT_p[:, :, pad0:pad0 + T0] = lwT
    lb = np.asarray(params["lin_b"], np.float32).reshape(C0, T0)
    lb_p = np.zeros((C0, Tp0), np.float32)
    lb_p[:, pad0:pad0 + T0] = lb

    prepped = {
        "lin_wT": jnp.asarray(lwT_p.reshape(L, C0 * Tp0)),   # (L, C0*Tp0)
        "lin_b": jnp.asarray(lb_p.reshape(1, C0 * Tp0)),     # (1, C0*Tp0)
        "layers": [],
    }
    for i in range(num_layers):
        w, b = params["convs"][i]
        w = np.asarray(w, np.float32)
        b = np.asarray(b, np.float32)
        c_out, c_in, _ = w.shape
        if c_in != c_out:
            raise ValueError("SkipConnection residual requires in_channels == out_channels")

        # Block-diagonal (over batch) im2col weight: one matmul handles the whole (B*C, T) slab.
        #   wb[b*Cout + o, k*B*Cin + b*Cin + i] = w[o, i, k]
        wb = np.zeros((B * c_out, K * B * c_in), np.float32)
        for kk in range(K):
            for bi in range(B):
                wb[bi * c_out:(bi + 1) * c_out,
                   kk * B * c_in + bi * c_in:kk * B * c_in + (bi + 1) * c_in] = w[:, :, kk]
        bb = np.tile(b, B)[:, None]                                       # (B*Cout, 1)

        # Nearest-neighbour upsample 0/1 matrix; NEXT layer's 'same' padding pre-folded as
        # zero border columns so `h @ U` is already padded for the following conv.
        t_in, t_out = timesteps[i], timesteps[i + 1]
        pad_next = (2 ** (i + 1)) * (K - 1) // 2 if i < num_layers - 1 else 0
        # TODO(synk): floor(t*T_in/T_out) matches torch nn.Upsample mode='nearest' (default),
        #             NOT mode='nearest-exact'.
        idx = (np.arange(t_out) * t_in) // t_out
        U = np.zeros((t_in, t_out + 2 * pad_next), np.float32)
        U[idx, pad_next + np.arange(t_out)] = 1.0

        prepped["layers"].append((jnp.asarray(wb), jnp.asarray(bb), jnp.asarray(U)))
    return prepped


# --------------------------- pure-JAX reference ------------------------------

def reference_forward(params, x, channels, timesteps, kernel_size):
    channels = list(channels[::-1])
    timesteps = list(timesteps[::-1])
    h = x @ params["lin_w"].T + params["lin_b"]
    h = h.reshape(x.shape[0], channels[0], timesteps[0])  # (B, C, T)
    for i in range(len(timesteps) - 1):
        w, b = params["convs"][i]
        d = 2 ** i
        pad = d * (kernel_size - 1) // 2
        y = lax.conv_general_dilated(
            h, w, window_strides=(1,), padding=[(pad, pad)], rhs_dilation=(d,),
            dimension_numbers=("NCH", "OIH", "NCH"))
        y = jax.nn.gelu(y + b[None, :, None], approximate=True)
        h = y + h
        t_in, t_out = h.shape[-1], timesteps[i + 1]
        idx = (np.arange(t_out) * t_in) // t_out
        h = jnp.take(h, jnp.asarray(idx), axis=-1)
    return h


# ---------------------------------- main -------------------------------------

if __name__ == "__main__":
    latent_dim = 32
    channels = [4, 4, 4]    # encoder order (all equal so the residual skip add is valid)
    timesteps = [16, 8, 4]  # encoder order (decoder runs them reversed: 4 -> 8 -> 16)
    kernel_size = 3
    B = 2

    key = jax.random.PRNGKey(0)
    kp, kx = jax.random.split(key)
    raw_params = init_params(kp, latent_dim, channels, timesteps, kernel_size)
    prepped = prepare_params(raw_params, channels, timesteps, kernel_size, B)
    x = jax.random.normal(kx, (B, latent_dim), jnp.float32)

    out = skip_decoder_forward(prepped, x, channels, timesteps, kernel_size)
    out = jax.block_until_ready(out)

    ref = reference_forward(raw_params, x, channels, timesteps, kernel_size)
    np.testing.assert_allclose(np.asarray(out), np.asarray(ref), atol=1e-4, rtol=1e-4)
    assert out.shape == (B, channels[0], timesteps[0])  # (2, 4, 16)

    print("KERNEL_OK")
</pallas_src>

<mosaic_0001>
module attributes {stable_mosaic.version = 11 : i64} {
  func.func @kernel(%arg0: i32, %arg1: memref<2x32xf32, #tpu.memory_space<vmem>>, %arg2: memref<32x24xf32, #tpu.memory_space<vmem>>, %arg3: memref<1x24xf32, #tpu.memory_space<vmem>>, %arg4: memref<8x24xf32, #tpu.memory_space<vmem>>, %arg5: memref<8x1xf32, #tpu.memory_space<vmem>>, %arg6: memref<4x12xf32, #tpu.memory_space<vmem>>, %arg7: memref<8x24xf32, #tpu.memory_space<vmem>>, %arg8: memref<8x1xf32, #tpu.memory_space<vmem>>, %arg9: memref<8x16xf32, #tpu.memory_space<vmem>>, %arg10: memref<8x16xf32, #tpu.memory_space<vmem>>) attributes {dimension_semantics = [#tpu.dimension_semantics<arbitrary>], iteration_bounds = array<i64: 1>, scalar_prefetch = 0 : i64, scratch_operands = 0 : i64, tpu.core_type = #tpu.core_type<tc>, window_params = [{pipeline_mode = #tpu.pipeline_mode<synchronous>, transform_indices = @transform_0, window_bounds = array<i64: 2, 32>}, {pipeline_mode = #tpu.pipeline_mode<synchronous>, transform_indices = @transform_1, window_bounds = array<i64: 32, 24>}, {pipeline_mode = #tpu.pipeline_mode<synchronous>, transform_indices = @transform_2, window_bounds = array<i64: 1, 24>}, {pipeline_mode = #tpu.pipeline_mode<synchronous>, transform_indices = @transform_3, window_bounds = array<i64: 8, 24>}, {pipeline_mode = #tpu.pipeline_mode<synchronous>, transform_indices = @transform_4, window_bounds = array<i64: 8, 1>}, {pipeline_mode = #tpu.pipeline_mode<synchronous>, transform_indices = @transform_5, window_bounds = array<i64: 4, 12>}, {pipeline_mode = #tpu.pipeline_mode<synchronous>, transform_indices = @transform_6, window_bounds = array<i64: 8, 24>}, {pipeline_mode = #tpu.pipeline_mode<synchronous>, transform_indices = @transform_7, window_bounds = array<i64: 8, 1>}, {pipeline_mode = #tpu.pipeline_mode<synchronous>, transform_indices = @transform_8, window_bounds = array<i64: 8, 16>}, {pipeline_mode = #tpu.pipeline_mode<synchronous>, transform_indices = @transform_9, window_bounds = array<i64: 8, 16>}]} {
    %c0 = arith.constant 0 : index
    %c0_0 = arith.constant 0 : index
    %0 = vector.load %arg1[%c0, %c0_0] : memref<2x32xf32, #tpu.memory_space<vmem>>, vector<2x32xf32>
    %c0_1 = arith.constant 0 : index
    %c0_2 = arith.constant 0 : index
    %1 = vector.load %arg2[%c0_1, %c0_2] : memref<32x24xf32, #tpu.memory_space<vmem>>, vector<32x24xf32>
    %cst = arith.constant dense<0.000000e+00> : vector<2x24xf32>
    %2 = tpu.matmul %0, %1, %cst {dimension_numbers = #tpu.dot_dimension_numbers<[1], [0], [0], [1], [0, 0, 1, 1], [], []>} : vector<2x32xf32>, vector<32x24xf32>, vector<2x24xf32> -> vector<2x24xf32>
    %c0_3 = arith.constant 0 : index
    %c0_4 = arith.constant 0 : index
    %3 = vector.load %arg3[%c0_3, %c0_4] : memref<1x24xf32, #tpu.memory_space<vmem>>, vector<1x24xf32>
    %4 = vector.broadcast %3 : vector<1x24xf32> to vector<2x24xf32>
    %5 = arith.addf %2, %4 : vector<2x24xf32>
    %6 = vector.extract_strided_slice %5 {offsets = [0, 0], sizes = [1, 6], strides = [1, 1]} : vector<2x24xf32> to vector<1x6xf32>
    %7 = vector.extract_strided_slice %5 {offsets = [0, 6], sizes = [1, 6], strides = [1, 1]} : vector<2x24xf32> to vector<1x6xf32>
    %8 = vector.extract_strided_slice %5 {offsets = [0, 12], sizes = [1, 6], strides = [1, 1]} : vector<2x24xf32> to vector<1x6xf32>
    %9 = vector.extract_strided_slice %5 {offsets = [0, 18], sizes = [1, 6], strides = [1, 1]} : vector<2x24xf32> to vector<1x6xf32>
    %10 = vector.extract_strided_slice %5 {offsets = [1, 0], sizes = [1, 6], strides = [1, 1]} : vector<2x24xf32> to vector<1x6xf32>
    %11 = vector.extract_strided_slice %5 {offsets = [1, 6], sizes = [1, 6], strides = [1, 1]} : vector<2x24xf32> to vector<1x6xf32>
    %12 = vector.extract_strided_slice %5 {offsets = [1, 12], sizes = [1, 6], strides = [1, 1]} : vector<2x24xf32> to vector<1x6xf32>
    %13 = vector.extract_strided_slice %5 {offsets = [1, 18], sizes = [1, 6], strides = [1, 1]} : vector<2x24xf32> to vector<1x6xf32>
    %14 = tpu.concatenate %6, %7, %8, %9, %10, %11, %12, %13 in 0 : vector<1x6xf32>, vector<1x6xf32>, vector<1x6xf32>, vector<1x6xf32>, vector<1x6xf32>, vector<1x6xf32>, vector<1x6xf32>, vector<1x6xf32> -> vector<8x6xf32>
    %15 = vector.extract_strided_slice %14 {offsets = [0, 0], sizes = [8, 4], strides = [1, 1]} : vector<8x6xf32> to vector<8x4xf32>
    %16 = vector.extract_strided_slice %14 {offsets = [0, 1], sizes = [8, 4], strides = [1, 1]} : vector<8x6xf32> to vector<8x4xf32>
    %17 = vector.extract_strided_slice %14 {offsets = [0, 2], sizes = [8, 4], strides = [1, 1]} : vector<8x6xf32> to vector<8x4xf32>
    %18 = tpu.concatenate %15, %16, %17 in 0 : vector<8x4xf32>, vector<8x4xf32>, vector<8x4xf32> -> vector<24x4xf32>
    %c0_5 = arith.constant 0 : index
    %c0_6 = arith.constant 0 : index
    %19 = vector.load %arg4[%c0_5, %c0_6] : memref<8x24xf32, #tpu.memory_space<vmem>>, vector<8x24xf32>
    %cst_7 = arith.constant dense<0.000000e+00> : vector<8x4xf32>
    %20 = tpu.matmul %19, %18, %cst_7 {dimension_numbers = #tpu.dot_dimension_numbers<[1], [0], [0], [1], [0, 0, 1, 1], [], []>} : vector<8x24xf32>, vector<24x4xf32>, vector<8x4xf32> -> vector<8x4xf32>
    %c0_8 = arith.constant 0 : index
    %c0_9 = arith.constant 0 : index
    %21 = vector.load %arg5[%c0_8, %c0_9] : memref<8x1xf32, #tpu.memory_space<vmem>>, vector<8x1xf32>
    %22 = vector.broadcast %21 : vector<8x1xf32> to vector<8x4xf32>
    %23 = arith.addf %20, %22 : vector<8x4xf32>
    %24 = arith.mulf %23, %23 : vector<8x4xf32>
    %25 = arith.mulf %23, %24 : vector<8x4xf32>
    %cst_10 = arith.constant 4.471500e-02 : f32
    %26 = vector.broadcast %cst_10 : f32 to vector<8x4xf32>
    %27 = arith.mulf %26, %25 : vector<8x4xf32>
    %28 = arith.addf %23, %27 : vector<8x4xf32>
    %cst_11 = arith.constant 0.797884583 : f32
    %29 = vector.broadcast %cst_11 : f32 to vector<8x4xf32>
    %30 = arith.mulf %29, %28 : vector<8x4xf32>
    %31 = math.tanh %30 : vector<8x4xf32>
    %cst_12 = arith.constant 1.000000e+00 : f32
    %32 = vector.broadcast %cst_12 : f32 to vector<8x4xf32>
    %33 = arith.addf %32, %31 : vector<8x4xf32>
    %cst_13 = arith.constant 5.000000e-01 : f32
    %34 = vector.broadcast %cst_13 : f32 to vector<8x4xf32>
    %35 = arith.mulf %34, %33 : vector<8x4xf32>
    %36 = arith.mulf %23, %35 : vector<8x4xf32>
    %37 = arith.addf %36, %16 : vector<8x4xf32>
    %c0_14 = arith.constant 0 : index
    %c0_15 = arith.constant 0 : index
    %38 = vector.load %arg6[%c0_14, %c0_15] : memref<4x12xf32, #tpu.memory_space<vmem>>, vector<4x12xf32>
    %cst_16 = arith.constant dense<0.000000e+00> : vector<8x12xf32>
    %39 = tpu.matmul %37, %38, %cst_16 {dimension_numbers = #tpu.dot_dimension_numbers<[1], [0], [0], [1], [0, 0, 1, 1], [], []>} : vector<8x4xf32>, vector<4x12xf32>, vector<8x12xf32> -> vector<8x12xf32>
    %40 = vector.extract_strided_slice %39 {offsets = [0, 0], sizes = [8, 8], strides = [1, 1]} : vector<8x12xf32> to vector<8x8xf32>
    %41 = vector.extract_strided_slice %39 {offsets = [0, 2], sizes = [8, 8], strides = [1, 1]} : vector<8x12xf32> to vector<8x8xf32>
    %42 = vector.extract_strided_slice %39 {offsets = [0, 4], sizes = [8, 8], strides = [1, 1]} : vector<8x12xf32> to vector<8x8xf32>
    %43 = tpu.concatenate %40, %41, %42 in 0 : vector<8x8xf32>, vector<8x8xf32>, vector<8x8xf32> -> vector<24x8xf32>
    %c0_17 = arith.constant 0 : index
    %c0_18 = arith.constant 0 : index
    %44 = vector.load %arg7[%c0_17, %c0_18] : memref<8x24xf32, #tpu.memory_space<vmem>>, vector<8x24xf32>
    %cst_19 = arith.constant dense<0.000000e+00> : vector<8x8xf32>
    %45 = tpu.matmul %44, %43, %cst_19 {dimension_numbers = #tpu.dot_dimension_numbers<[1], [0], [0], [1], [0, 0, 1, 1], [], []>} : vector<8x24xf32>, vector<24x8xf32>, vector<8x8xf32> -> vector<8x8xf32>
    %c0_20 = arith.constant 0 : index
    %c0_21 = arith.constant 0 : index
    %46 = vector.load %arg8[%c0_20, %c0_21] : memref<8x1xf32, #tpu.memory_space<vmem>>, vector<8x1xf32>
    %47 = vector.broadcast %46 : vector<8x1xf32> to vector<8x8xf32>
    %48 = arith.addf %45, %47 : vector<8x8xf32>
    %49 = arith.mulf %48, %48 : vector<8x8xf32>
    %50 = arith.mulf %48, %49 : vector<8x8xf32>
    %cst_22 = arith.constant 4.471500e-02 : f32
    %51 = vector.broadcast %cst_22 : f32 to vector<8x8xf32>
    %52 = arith.mulf %51, %50 : vector<8x8xf32>
    %53 = arith.addf %48, %52 : vector<8x8xf32>
    %cst_23 = arith.constant 0.797884583 : f32
    %54 = vector.broadcast %cst_23 : f32 to vector<8x8xf32>
    %55 = arith.mulf %54, %53 : vector<8x8xf32>
    %56 = math.tanh %55 : vector<8x8xf32>
    %cst_24 = arith.constant 1.000000e+00 : f32
    %57 = vector.broadcast %cst_24 : f32 to vector<8x8xf32>
    %58 = arith.addf %57, %56 : vector<8x8xf32>
    %cst_25 = arith.constant 5.000000e-01 : f32
    %59 = vector.broadcast %cst_25 : f32 to vector<8x8xf32>
    %60 = arith.mulf %59, %58 : vector<8x8xf32>
    %61 = arith.mulf %48, %60 : vector<8x8xf32>
    %62 = arith.addf %61, %41 : vector<8x8xf32>
    %c0_26 = arith.constant 0 : index
    %c0_27 = arith.constant 0 : index
    %63 = vector.load %arg9[%c0_26, %c0_27] : memref<8x16xf32, #tpu.memory_space<vmem>>, vector<8x16xf32>
    %cst_28 = arith.constant dense<0.000000e+00> : vector<8x16xf32>
    %64 = tpu.matmul %62, %63, %cst_28 {dimension_numbers = #tpu.dot_dimension_numbers<[1], [0], [0], [1], [0, 0, 1, 1], [], []>} : vector<8x8xf32>, vector<8x16xf32>, vector<8x16xf32> -> vector<8x16xf32>
    %c0_29 = arith.constant 0 : index
    %c0_30 = arith.constant 0 : index
    %65 = vector.load %arg10[%c0_29, %c0_30] : memref<8x16xf32, #tpu.memory_space<vmem>>, vector<8x16xf32>
    tpu.vector_store %arg10[%c0_29, %c0_30], %64 {strides = array<i32>} : memref<8x16xf32, #tpu.memory_space<vmem>>, vector<8x16xf32>,
    return
  }
  func.func @transform_0(%arg0: i32) -> (i32, i32) {
    %c0_i32 = arith.constant 0 : i32
    %c0_i32_0 = arith.constant 0 : i32
    %c0_i32_1 = arith.constant 0 : i32
    return %c0_i32, %c0_i32_0 : i32, i32
  }
  func.func @transform_1(%arg0: i32) -> (i32, i32) {
    %c0_i32 = arith.constant 0 : i32
    %c0_i32_0 = arith.constant 0 : i32
    %c0_i32_1 = arith.constant 0 : i32
    return %c0_i32, %c0_i32_0 : i32, i32
  }
  func.func @transform_2(%arg0: i32) -> (i32, i32) {
    %c0_i32 = arith.constant 0 : i32
    %c0_i32_0 = arith.constant 0 : i32
    %c0_i32_1 = arith.constant 0 : i32
    return %c0_i32, %c0_i32_0 : i32, i32
  }
  func.func @transform_3(%arg0: i32) -> (i32, i32) {
    %c0_i32 = arith.constant 0 : i32
    %c0_i32_0 = arith.constant 0 : i32
    %c0_i32_1 = arith.constant 0 : i32
    return %c0_i32, %c0_i32_0 : i32, i32
  }
  func.func @transform_4(%arg0: i32) -> (i32, i32) {
    %c0_i32 = arith.constant 0 : i32
    %c0_i32_0 = arith.constant 0 : i32
    %c0_i32_1 = arith.constant 0 : i32
    return %c0_i32, %c0_i32_0 : i32, i32
  }
  func.func @transform_5(%arg0: i32) -> (i32, i32) {
    %c0_i32 = arith.constant 0 : i32
    %c0_i32_0 = arith.constant 0 : i32
    %c0_i32_1 = arith.constant 0 : i32
    return %c0_i32, %c0_i32_0 : i32, i32
  }
  func.func @transform_6(%arg0: i32) -> (i32, i32) {
    %c0_i32 = arith.constant 0 : i32
    %c0_i32_0 = arith.constant 0 : i32
    %c0_i32_1 = arith.constant 0 : i32
    return %c0_i32, %c0_i32_0 : i32, i32
  }
  func.func @transform_7(%arg0: i32) -> (i32, i32) {
    %c0_i32 = arith.constant 0 : i32
    %c0_i32_0 = arith.constant 0 : i32
    %c0_i32_1 = arith.constant 0 : i32
    return %c0_i32, %c0_i32_0 : i32, i32
  }
  func.func @transform_8(%arg0: i32) -> (i32, i32) {
    %c0_i32 = arith.constant 0 : i32
    %c0_i32_0 = arith.constant 0 : i32
    %c0_i32_1 = arith.constant 0 : i32
    return %c0_i32, %c0_i32_0 : i32, i32
  }
  func.func @transform_9(%arg0: i32) -> (i32, i32) {
    %c0_i32 = arith.constant 0 : i32
    %c0_i32_0 = arith.constant 0 : i32
    %c0_i32_1 = arith.constant 0 : i32
    return %c0_i32, %c0_i32_0 : i32, i32
  }
}

</mosaic_0001>

<bundles_post_ra>
// kernel: tpu_custom_call.1
= control target key start
LH: loop header
LB: loop body
LE: loop exit
PB: predicated region body
PF: predicated region fallthrough
CT: control target
= control target key end

     0   :  { %v623_v1 = vmov 0.0   ;;  %vm624_vm0 = vmmov 0   ;;  %s750_s0 = inlined_call_operand.vmem [shape: f32[2,32], index: 0, kind: input, shape index: {}]   ;;  %s751_s1 = inlined_call_operand.vmem [shape: f32[32,24], index: 1, kind: input, shape index: {}]   ;;  %s752_s2 = inlined_call_operand.vmem [shape: f32[1,24], index: 2, kind: input, shape index: {}]   ;;  %s753_s3 = inlined_call_operand.vmem [shape: f32[8,24], index: 3, kind: input, shape index: {}]   ;;  %s754_s4 = inlined_call_operand.vmem [shape: f32[8,1], index: 4, kind: input, shape index: {}]   ;;  %s755_s5 = inlined_call_operand.vmem [shape: f32[4,12], index: 5, kind: input, shape index: {}]   ;;  %s756_s6 = inlined_call_operand.vmem [shape: f32[8,24], index: 6, kind: input, shape index: {}]   ;;  %s757_s7 = inlined_call_operand.vmem [shape: f32[8,1], index: 7, kind: input, shape index: {}]   ;;  %s758_s8 = inlined_call_operand.vmem [shape: f32[8,16], index: 8, kind: input, shape index: {}]   ;;  %s759_s9 = inlined_call_operand.hbm [shape: f32[8,16], index: 9, kind: output, shape index: {}]  }
   0x1   :  { %v37_v0 = vld [vmem:[%s751_s1 + $0x18] sm:$0xff]  ;;  %547 = vmatprep.subr.mxu0 %v623_v1  ;;  %v36_v2 = vld [vmem:[%s751_s1 + $0x10] sm:$0xff]  ;;  %555 = vmatprep.mubr.msk.f32.mxu0 %vm624_vm0, %v623_v1 }
   0x2   :  { %548 = vmatpush3.msra.mxu0 %v37_v0  ;;  %558 = vmatprep.subr.mxu1 %v623_v1 }
   0x3   :  { %14 = vsyncpa [#allocation3], 0  ;;  %549 = vmatprep.subr.mxu0 %v623_v1  ;;  %v35_v3 = vld [vmem:[%s751_s1 + $0x8] sm:$0xff]  ;;  %564 = vmatprep.mubr.msk.f32.mxu1 %vm624_vm0, %v623_v1  ;;  %v34_v4 = vld [vmem:[%s751_s1] sm:$0xff]  ;;  %vm45_vm1 = vcmask 261120   ;;  %s626_s1 = smov 122  }
   0x4   :  { %550 = vmatpush3.msra.mxu0 %v36_v2  ;;  %v33_v5 = vld [vmem:[%s750_s0] sm:$0x3]  ;;  %s625_s0 = smov 110   ;;  %s627_s21 = smov 116   ;;  %vm145_vm2 = vcmask 1040384   ;;  %vm147_vm3 = vcmask 1041408  }
   0x5   :  { %551 = vmatprep.subr.mxu0 %v623_v1  ;;  %v523_v6 = vld [vmem:[%s752_s2] ss:$0 sm:$0xff]  ;;  %vm149_vm4 = vcmask 1042432   ;;  %vm151_vm5 = vcmask 1043456   ;;  %v628_v21 = vmov 0   ;;  %vm153_vm6 = vcmask 1044480  }
   0x6   :  { %552 = vmatpush3.msra.mxu0 %v35_v3  ;;  %596 = vset.pattern.permute.xlu0 %v628_v21  ;;  %vm155_vm7 = vcmask 1045504   ;;  %vm157_vm8 = vcmask 1046528   ;;  %s629_s2 = smov 127   ;;  %s630_s22 = smov 126   ;;  %v167_v30 = vld [vmem:[%s754_s4] sm:$0xff]  ;;  %vm173_vm9 = vcmask 195584  }
   0x7   :  { %553 = vmatprep.subr.mxu0 %v623_v1  ;;  %v343_v31 = vld [vmem:[%s757_s7] sm:$0xff]  ;;  %vm258_vm10 = vcmask 31744   ;;  %vm433_vm11 = vcmask 64512   ;;  %vm507_vm12 = vcmask 130048  }
   0x8   :  { %554 = vmatpush3.msra.mxu0 %v34_v4  ;;  %v166_v34 = vld [vmem:[%s753_s3] sm:$0xff]  ;;  %s631_s3 = smov 124  }
   0x9   :  { %556 = vmatmul.mubr.msk.f32.vlgmr.msra.gmra.mxu0 %vm45_vm1, %v33_v5  ;;  %572 = vmatprep.subr.mxu0 %v623_v1  ;;  %v257_v35 = vld [vmem:[%s755_s5] sm:$0xf] }
   0xa   :  { %578 = vmatprep.mubr.msk.f32.mxu0 %vm624_vm0, %v623_v1  ;;  %v342_v54 = vld [vmem:[%s756_s6] sm:$0xff]  ;;  %s632_s6 = smov [#allocation2]  }
   0xb   :  { %v432_v55 = vld [vmem:[%s758_s8] sm:$0xff]  ;;  %s515_s8 = sshll.u32 %s632_s6, 4  ;;  %s516_s8 = int_to_ptr.vmem [resolvable:$true] %s515_s8 }
   0xc   :  { %s601_s11 = scalar_lea.vmem %s516_s8, 128  ;;  %p606_p1 = scmp.lt.s32.totalorder %s516_s8, %s516_s8 }
   0xd   :  { %p602_p0 = scmp.ne.s32.totalorder %s516_s8, %s601_s11  ;;  %p607_p2 = scmp.lt.s32.totalorder %s601_s11, %s601_s11 }
   0xf   :  { %p608_p3 = por %p607_p2, %p606_p1 }
  0x11   :  { %p609_p4 = pnand %p608_p3, %p602_p0 }
  0xc9   :  { %v115_v7 = vpop.f32.mrf.mxu0 }
  0xca   :  { %v116_v8 = vadd.f32 %v523_v6, %v115_v7 }
  0xcb   :  { %v557_v9 = vpop.f32.mrf.mxu0 }
  0xcc   :  { %v128_v10 = vrot.slane %v116_v8, 5  ;;  %v120_v11 = vrot.slane %v116_v8, 7  ;;  %v133_v12 = vrot.slane %v116_v8, 4  ;;  %v124_v13 = vrot.slane %v116_v8, 6 }
  0xcd   :  { %v141_v14 = vrot.slane %v116_v8, 2  ;;  %v137_v15 = vrot.slane %v116_v8, 3 }
  0xce   :  { %129 = vrot.lane.b32.xlu1 %v128_v10, %s625_s0  ;;  %121 = vrot.lane.b32.xlu0 %v120_v11, %s626_s1 }
  0xd2   :  { %134 = vrot.lane.b32.xlu1 %v133_v12, %s626_s1  ;;  %125 = vrot.lane.b32.xlu0 %v124_v13, %s627_s21 }
  0xd6   :  { %142 = vrot.lane.b32.xlu1 %v141_v14, %s625_s0  ;;  %138 = vrot.lane.b32.xlu0 %v137_v15, %s627_s21 }
 0x140   :  { %v130_v16 = vpop.permute.xlu1 %129  ;;  %v122_v17 = vpop.permute.xlu0 %121 }
 0x141   :  { %v146_v18 = vsel %vm145_vm2, %v116_v8, %v122_v17 }
 0x144   :  { %v135_v19 = vpop.permute.xlu1 %134  ;;  %v126_v20 = vpop.permute.xlu0 %125 }
 0x145   :  { %v148_v22 = vsel %vm147_vm3, %v146_v18, %v126_v20 }
 0x146   :  { %v150_v23 = vsel %vm149_vm4, %v148_v22, %v130_v16 }
 0x147   :  { %v152_v24 = vsel %vm151_vm5, %v150_v23, %v128_v10 }
 0x148   :  { %v143_v25 = vpop.permute.xlu1 %142  ;;  %v154_v26 = vsel %vm153_vm6, %v152_v24, %v135_v19  ;;  %v139_v27 = vpop.permute.xlu0 %138 }
 0x149   :  { %v156_v28 = vsel %vm155_vm7, %v154_v26, %v139_v27 }
 0x14a   :  { %v158_v29 = vsel %vm157_vm8, %v156_v28, %v143_v25 }
 0x14b   :  { %160 = vrot.lane.b32.xlu1 %v158_v29, %s629_s2  ;;  %163 = vrot.lane.b32.xlu0 %v158_v29, %s630_s22 }
 0x14f   :  { %170 = vperm.xlu0 %596, %v167_v30  }
 0x153   :  { %346 = vperm.xlu0 %596, %v343_v31  }
 0x1bd   :  { %v164_v32 = vpop.permute.xlu0 %163  ;;  %v161_v33 = vpop.permute.xlu1 %160 }
 0x1be   :  { %559 = vmatpush3.msra.mxu1 %v164_v32 }
 0x1bf   :  { %560 = vmatprep.subr.mxu1 %v623_v1 }
 0x1c0   :  { %561 = vmatpush3.msra.mxu1 %v161_v33 }
 0x1c1   :  { %562 = vmatprep.subr.mxu1 %v623_v1 }
 0x1c2   :  { %563 = vmatpush3.msra.mxu1 %v158_v29 }
 0x1c3   :  { %565 = vmatmul.mubr.msk.f32.vlgmr.msra.gmra.mxu1 %vm173_vm9, %v166_v34  ;;  %567 = vmatprep.subr.mxu1 %v623_v1 }
 0x1c4   :  { %569 = vmatprep.mubr.msk.f32.mxu1 %vm624_vm0, %v623_v1  ;;  %568 = vmatpush3.msk.msra.mxu1 %vm151_vm5, %v257_v35 }
 0x1c5   :  { %581 = vmatprep.subr.mxu1 %v623_v1 }
 0x1ca   :  { %v171_v36 = vpop.permute.xlu0 %170 }
 0x1ce   :  { %v347_v56 = vpop.permute.xlu0 %346 }
 0x283   :  { %v243_v37 = vpop.f32.mrf.mxu1 }
 0x284   :  { %v244_v38 = vadd.f32 %v243_v37, %v171_v36 }
 0x285   :  { %v566_v39 = vpop.f32.mrf.mxu1 }
 0x286   :  { %v247_v40 = vmul.f32 %v244_v38, %v244_v38 }
 0x288   :  { %v248_v41 = vmul.f32 %v247_v40, %v244_v38 }
 0x28a   :  { %v249_v42 = vmul.f32 0.044715, %v248_v41 }
 0x28c   :  { %v250_v43 = vadd.f32 %v249_v42, %v244_v38 }
 0x28e   :  { %v251_v44 = vmul.f32 0.7978846, %v250_v43 }
 0x290   :  { %597 = vtanh.f32 %v251_v44 }
 0x29d   :  { %v598_v45 = vpop.eup %597 }
 0x29e   :  { %v253_v46 = vadd.f32 1.0, %v598_v45 }
 0x2a0   :  { %v254_v47 = vmul.f32 0.5, %v253_v46 }
 0x2a2   :  { %v255_v48 = vmul.f32 %v254_v47, %v244_v38 }
 0x2a4   :  { %v256_v49 = vadd.f32 %v255_v48, %v161_v33 }
 0x2a6   :  { %570 = vmatmul.mubr.msk.f32.vlgmr.msra.gmra.mxu1 %vm258_vm10, %v256_v49 }
 0x2a7   :  { %583 = vmatprep.mubr.msk.f32.mxu1 %vm624_vm0, %v623_v1  ;;  %582 = vmatpush3.msra.mxu1 %v432_v55 }
 0x366   :  { %v331_v50 = vpop.f32.mrf.mxu1 }
 0x367   :  { %339 = vrot.lane.b32.xlu1 %v331_v50, %s631_s3 }
 0x368   :  { %v571_v51 = vpop.f32.mrf.mxu1 }
 0x36b   :  { %336 = vrot.lane.b32.xlu1 %v331_v50, %s630_s22 }
 0x3d9   :  { %v340_v52 = vpop.permute.xlu1 %339 }
 0x3da   :  { %573 = vmatpush3.msra.mxu0 %v340_v52 }
 0x3db   :  { %574 = vmatprep.subr.mxu0 %v623_v1 }
 0x3dd   :  { %v337_v53 = vpop.permute.xlu1 %336 }
 0x3de   :  { %575 = vmatpush3.msra.mxu0 %v337_v53 }
 0x3df   :  { %576 = vmatprep.subr.mxu0 %v623_v1 }
 0x3e0   :  { %577 = vmatpush3.msra.mxu0 %v331_v50 }
 0x3e1   :  { %579 = vmatmul.mubr.msk.f32.vlgmr.msra.gmra.mxu0 %vm173_vm9, %v342_v54 }
 0x4a1   :  { %v418_v57 = vpop.f32.mrf.mxu0 }
 0x4a2   :  { %v419_v58 = vadd.f32 %v418_v57, %v347_v56 }
 0x4a3   :  { %v580_v59 = vpop.f32.mrf.mxu0 }
 0x4a4   :  { %v422_v60 = vmul.f32 %v419_v58, %v419_v58 }
 0x4a6   :  { %v423_v61 = vmul.f32 %v422_v60, %v419_v58 }
 0x4a8   :  { %v424_v62 = vmul.f32 0.044715, %v423_v61 }
 0x4aa   :  { %v425_v63 = vadd.f32 %v424_v62, %v419_v58 }
 0x4ac   :  { %v426_v0 = vmul.f32 0.7978846, %v425_v63 }
 0x4ae   :  { %599 = vtanh.f32 %v426_v0 }
 0x4bb   :  { %v600_v2 = vpop.eup %599 }
 0x4bc   :  { %v428_v1 = vadd.f32 1.0, %v600_v2 }
 0x4be   :  { %v429_v3 = vmul.f32 0.5, %v428_v1 }
 0x4c0   :  { %v430_v4 = vmul.f32 %v429_v3, %v419_v58 }
 0x4c2   :  { %v431_v5 = vadd.f32 %v430_v4, %v337_v53 }
 0x4c4   :  { %584 = vmatmul.mubr.msk.f32.vlgmr.msra.gmra.mxu1 %vm433_vm11, %v431_v5 }
 0x584   :  { %v503_v6 = vpop.f32.mrf.mxu1 }
 0x585   :  { %508 = vst.msk [vmem:[#allocation2] sm:$0xff] %vm507_vm12, %v503_v6 }
 0x586   :  { %v585_v7 = vpop.f32.mrf.mxu1 }
 0x587   :  { %612 = shalt.err (!%p609_p4)
}
 0x588   :  { %518 = dma.vmem_to_hbm [thread:$0]  %s516_s8, 128, %s759_s9, [#allocation3]  }
 0x589   :  { %621 = dma.done.wait [#allocation3], 128  }
 0x58a   :  { %622 = vsyncadd [#allocation3], 4294967168 }
 0x58b   :  { %522 = vsyncpa [#allocation3], 1 }

</bundles_post_ra>
